<compile_context>
chip_gen: v7x
topology: tpu7x:2x2x1
jax: 0.10.0
libtpu: 0.0.40
codegen_flags: <defaults>
</compile_context>

<pallas_src>
import functools

import jax
import jax.numpy as jnp
from jax.experimental import pallas as pl
from jax.experimental.pallas import tpu as pltpu


def _geo_cross_attn_kernel(q_ref, k_ref, vt_ref, ot_ref,
                           m_sc, l_sc, acc_sc, *, scale):
    # q_ref : (TN, C)    k_ref : (TK, C)    vt_ref : (Dv, TK)
    # ot_ref: (Dv, TN)   scratch: m/l (1, TN) f32, acc (Dv, TN) f32
    kt = pl.program_id(2)

    @pl.when(kt == 0)
    def _():
        m_sc[...] = jnp.full(m_sc.shape, -jnp.inf, dtype=m_sc.dtype)
        l_sc[...] = jnp.zeros(l_sc.shape, dtype=l_sc.dtype)
        acc_sc[...] = jnp.zeros(acc_sc.shape, dtype=acc_sc.dtype)

    q = q_ref[...]                                   # (TN, C), native dtype
    if scale != 1.0:                                 # static python check
        q = q * jnp.asarray(scale, dtype=q.dtype)
    k = k_ref[...]                                   # (TK, C), native dtype

    # transposed scores: (TK, TN), queries on the lane axis, f32 accumulation
    s_t = jnp.dot(k, q.T, preferred_element_type=jnp.float32)

    m_prev = m_sc[...]                                                 # (1, TN)
    m_new = jnp.maximum(m_prev, jnp.max(s_t, axis=0, keepdims=True))   # (1, TN)
    alpha = jnp.exp(m_prev - m_new)                                    # (1, TN)
    p_t = jnp.exp(s_t - m_new)                                         # (TK, TN)

    l_sc[...] = alpha * l_sc[...] + jnp.sum(p_t, axis=0, keepdims=True)
    m_sc[...] = m_new

    v_t = vt_ref[...]                                                  # (Dv, TK)
    acc_sc[...] = alpha * acc_sc[...] + jnp.dot(
        v_t, p_t.astype(v_t.dtype), preferred_element_type=jnp.float32)

    @pl.when(kt == pl.num_programs(2) - 1)
    def _():
        inv_l = pl.reciprocal(l_sc[...], approx=True)                  # EUP vrcp
        ot_ref[...] = (acc_sc[...] * inv_l).astype(ot_ref.dtype)


def _pick_tile(total, candidates=(512, 256, 128)):
    for c in candidates:
        if total >= c and total % c == 0:
            return c
    return total          # small / odd axes: take the whole axis as one tile


def geo_cross_attention(q, k, v, *, num_heads=1, qk_scale=1.0):
    """Pallas TPU implementation of GeoCrossAttention.forward (eval mode).

    q: (B, N, C)   k: (B, NK, C)   v: (B, NK, Dv)   ->   (B, N, Dv)
    """
    assert num_heads == 1, "kernel written for num_heads == 1 (module default)"
    B, N, C = q.shape
    Bk, NK, Ck = k.shape
    Bv, NKv, Dv = v.shape
    assert Bk == B and Bv == B and Ck == C and NKv == NK

    # mirrors the PyTorch `qk_scale or head_dim ** -0.5` semantics exactly
    scale = float(qk_scale) if qk_scale else float((C // num_heads) ** (-0.5))

    TN = _pick_tile(N)
    TK = _pick_tile(NK)
    n_tiles = N // TN
    k_tiles = NK // TK

    # lane-dense layout: put keys / queries on the last (lane) axis of v / out
    v_t = jnp.swapaxes(v, 1, 2)                      # (B, Dv, NK)

    kernel = functools.partial(_geo_cross_attn_kernel, scale=scale)

    out_t = pl.pallas_call(
        kernel,
        out_shape=jax.ShapeDtypeStruct((B, Dv, N), q.dtype),
        grid_spec=pltpu.PrefetchScalarGridSpec(
            num_scalar_prefetch=0,
            grid=(B, n_tiles, k_tiles),
            in_specs=[
                pl.BlockSpec((None, TN, C), lambda b, n, kt: (b, n, 0)),
                pl.BlockSpec((None, TK, C), lambda b, n, kt: (b, kt, 0)),
                pl.BlockSpec((None, Dv, TK), lambda b, n, kt: (b, 0, kt)),
            ],
            out_specs=pl.BlockSpec((None, Dv, TN), lambda b, n, kt: (b, 0, n)),
            scratch_shapes=[
                pltpu.VMEM((1, TN), jnp.float32),    # running max
                pltpu.VMEM((1, TN), jnp.float32),    # running denom
                pltpu.VMEM((Dv, TN), jnp.float32),   # output accumulator
            ],
        ),
        compiler_params=pltpu.CompilerParams(
            dimension_semantics=("parallel", "parallel", "arbitrary")),
    )(q, k, v_t)

    return jnp.swapaxes(out_t, 1, 2)                 # (B, N, Dv)


def _reference(q, k, v, scale=1.0):
    # pure-JAX reference mirroring the PyTorch forward (num_heads=1, no dropout)
    s = jnp.einsum("bnc,bkc->bnk", q, k) * scale
    p = jax.nn.softmax(s, axis=-1)
    return jnp.einsum("bnk,bkd->bnd", p, v)


if __name__ == "__main__":
    B, N, NK, C, Dv = 2, 8, 16, 32, 3   # out_dim = C = 32, v feature dim = 3
    key = jax.random.PRNGKey(0)
    kq, kk, kv = jax.random.split(key, 3)
    q = jax.random.normal(kq, (B, N, C), dtype=jnp.float32)
    k = jax.random.normal(kk, (B, NK, C), dtype=jnp.float32)
    v = jax.random.normal(kv, (B, NK, Dv), dtype=jnp.float32)

    out = geo_cross_attention(q, k, v, num_heads=1, qk_scale=1.0)
    out = jax.block_until_ready(out)

    ref = _reference(q, k, v, scale=1.0)
    assert out.shape == (B, N, Dv)
    # tolerance accounts for the EUP approximate reciprocal in the softmax denom
    assert jnp.allclose(out, ref, atol=2e-2, rtol=2e-2), "mismatch vs reference"
    print("KERNEL_OK")
</pallas_src>

<mosaic_0001>
module attributes {stable_mosaic.version = 11 : i64} {
  func.func @_geo_cross_attn_kernel(%arg0: i32, %arg1: i32, %arg2: i32, %arg3: memref<1x8x32xf32, #tpu.memory_space<vmem>>, %arg4: memref<1x16x32xf32, #tpu.memory_space<vmem>>, %arg5: memref<1x3x16xf32, #tpu.memory_space<vmem>>, %arg6: memref<1x3x8xf32, #tpu.memory_space<vmem>>, %arg7: memref<1x8xf32, #tpu.memory_space<vmem>>, %arg8: memref<1x8xf32, #tpu.memory_space<vmem>>, %arg9: memref<3x8xf32, #tpu.memory_space<vmem>>) attributes {dimension_semantics = [#tpu.dimension_semantics<parallel>, #tpu.dimension_semantics<parallel>, #tpu.dimension_semantics<arbitrary>], iteration_bounds = array<i64: 2, 1, 1>, scalar_prefetch = 0 : i64, scratch_operands = 3 : i64, tpu.core_type = #tpu.core_type<tc>, window_params = [{transform_indices = @transform_0, window_bounds = array<i64: 1, 8, 32>}, {transform_indices = @transform_1, window_bounds = array<i64: 1, 16, 32>}, {transform_indices = @transform_2, window_bounds = array<i64: 1, 3, 16>}, {transform_indices = @transform_3, window_bounds = array<i64: 1, 3, 8>}]} {
    %c0_i32 = arith.constant 0 : i32
    %0 = arith.cmpi eq, %arg2, %c0_i32 : i32
    %1 = arith.extui %0 : i1 to i32
    %c0_i32_0 = arith.constant 0 : i32
    %2 = arith.cmpi ne, %1, %c0_i32_0 : i32
    scf.if %2 {
      %cst_26 = arith.constant 0xFF800000 : f32
      %36 = vector.broadcast %cst_26 : f32 to vector<1x8xf32>
      %c0_27 = arith.constant 0 : index
      %c0_28 = arith.constant 0 : index
      %37 = vector.load %arg7[%c0_27, %c0_28] : memref<1x8xf32, #tpu.memory_space<vmem>>, vector<1x8xf32>
      tpu.vector_store %arg7[%c0_27, %c0_28], %36 {strides = array<i32>} : memref<1x8xf32, #tpu.memory_space<vmem>>, vector<1x8xf32>,
      %cst_29 = arith.constant 0.000000e+00 : f32
      %38 = vector.broadcast %cst_29 : f32 to vector<1x8xf32>
      %c0_30 = arith.constant 0 : index
      %c0_31 = arith.constant 0 : index
      %39 = vector.load %arg8[%c0_30, %c0_31] : memref<1x8xf32, #tpu.memory_space<vmem>>, vector<1x8xf32>
      tpu.vector_store %arg8[%c0_30, %c0_31], %38 {strides = array<i32>} : memref<1x8xf32, #tpu.memory_space<vmem>>, vector<1x8xf32>,
      %cst_32 = arith.constant 0.000000e+00 : f32
      %40 = vector.broadcast %cst_32 : f32 to vector<3x8xf32>
      %c0_33 = arith.constant 0 : index
      %c0_34 = arith.constant 0 : index
      %41 = vector.load %arg9[%c0_33, %c0_34] : memref<3x8xf32, #tpu.memory_space<vmem>>, vector<3x8xf32>
      tpu.vector_store %arg9[%c0_33, %c0_34], %40 {strides = array<i32>} : memref<3x8xf32, #tpu.memory_space<vmem>>, vector<3x8xf32>,
    } else {
    }
    %c0 = arith.constant 0 : index
    %c0_1 = arith.constant 0 : index
    %c0_2 = arith.constant 0 : index
    %3 = vector.load %arg3[%c0, %c0_1, %c0_2] : memref<1x8x32xf32, #tpu.memory_space<vmem>>, vector<1x8x32xf32>
    %4 = vector.shape_cast %3 : vector<1x8x32xf32> to vector<8x32xf32>
    %c0_3 = arith.constant 0 : index
    %c0_4 = arith.constant 0 : index
    %c0_5 = arith.constant 0 : index
    %5 = vector.load %arg4[%c0_3, %c0_4, %c0_5] : memref<1x16x32xf32, #tpu.memory_space<vmem>>, vector<1x16x32xf32>
    %6 = vector.shape_cast %5 : vector<1x16x32xf32> to vector<16x32xf32>
    %7 = tpu.transpose %4, [1, 0] : vector<8x32xf32> -> vector<32x8xf32>
    %cst = arith.constant dense<0.000000e+00> : vector<16x8xf32>
    %8 = tpu.matmul %6, %7, %cst {dimension_numbers = #tpu.dot_dimension_numbers<[1], [0], [0], [1], [0, 0, 1, 1], [], []>} : vector<16x32xf32>, vector<32x8xf32>, vector<16x8xf32> -> vector<16x8xf32>
    %c0_6 = arith.constant 0 : index
    %c0_7 = arith.constant 0 : index
    %9 = vector.load %arg7[%c0_6, %c0_7] : memref<1x8xf32, #tpu.memory_space<vmem>>, vector<1x8xf32>
    %cst_8 = arith.constant dense<0xFF800000> : vector<8xf32>
    %10 = vector.multi_reduction <maximumf>, %8, %cst_8 [0] : vector<16x8xf32> to vector<8xf32>
    %11 = vector.shape_cast %10 : vector<8xf32> to vector<1x8xf32>
    %12 = arith.maximumf %9, %11 : vector<1x8xf32>
    %13 = arith.subf %9, %12 : vector<1x8xf32>
    %14 = math.exp %13 : vector<1x8xf32>
    %15 = vector.broadcast %12 : vector<1x8xf32> to vector<16x8xf32>
    %16 = arith.subf %8, %15 : vector<16x8xf32>
    %17 = math.exp %16 : vector<16x8xf32>
    %c0_9 = arith.constant 0 : index
    %c0_10 = arith.constant 0 : index
    %18 = vector.load %arg8[%c0_9, %c0_10] : memref<1x8xf32, #tpu.memory_space<vmem>>, vector<1x8xf32>
    %19 = arith.mulf %14, %18 : vector<1x8xf32>
    %cst_11 = arith.constant dense<0.000000e+00> : vector<8xf32>
    %20 = vector.multi_reduction <add>, %17, %cst_11 [0] : vector<16x8xf32> to vector<8xf32>
    %21 = vector.shape_cast %20 : vector<8xf32> to vector<1x8xf32>
    %22 = arith.addf %19, %21 : vector<1x8xf32>
    %c0_12 = arith.constant 0 : index
    %c0_13 = arith.constant 0 : index
    %23 = vector.load %arg8[%c0_12, %c0_13] : memref<1x8xf32, #tpu.memory_space<vmem>>, vector<1x8xf32>
    tpu.vector_store %arg8[%c0_12, %c0_13], %22 {strides = array<i32>} : memref<1x8xf32, #tpu.memory_space<vmem>>, vector<1x8xf32>,
    %c0_14 = arith.constant 0 : index
    %c0_15 = arith.constant 0 : index
    %24 = vector.load %arg7[%c0_14, %c0_15] : memref<1x8xf32, #tpu.memory_space<vmem>>, vector<1x8xf32>
    tpu.vector_store %arg7[%c0_14, %c0_15], %12 {strides = array<i32>} : memref<1x8xf32, #tpu.memory_space<vmem>>, vector<1x8xf32>,
    %c0_16 = arith.constant 0 : index
    %c0_17 = arith.constant 0 : index
    %c0_18 = arith.constant 0 : index
    %25 = vector.load %arg5[%c0_16, %c0_17, %c0_18] : memref<1x3x16xf32, #tpu.memory_space<vmem>>, vector<1x3x16xf32>
    %26 = vector.shape_cast %25 : vector<1x3x16xf32> to vector<3x16xf32>
    %c0_19 = arith.constant 0 : index
    %c0_20 = arith.constant 0 : index
    %27 = vector.load %arg9[%c0_19, %c0_20] : memref<3x8xf32, #tpu.memory_space<vmem>>, vector<3x8xf32>
    %28 = vector.broadcast %14 : vector<1x8xf32> to vector<3x8xf32>
    %29 = arith.mulf %28, %27 : vector<3x8xf32>
    %cst_21 = arith.constant dense<0.000000e+00> : vector<3x8xf32>
    %30 = tpu.matmul %26, %17, %cst_21 {dimension_numbers = #tpu.dot_dimension_numbers<[1], [0], [0], [1], [0, 0, 1, 1], [], []>} : vector<3x16xf32>, vector<16x8xf32>, vector<3x8xf32> -> vector<3x8xf32>
    %31 = arith.addf %29, %30 : vector<3x8xf32>
    %c0_22 = arith.constant 0 : index
    %c0_23 = arith.constant 0 : index
    %32 = vector.load %arg9[%c0_22, %c0_23] : memref<3x8xf32, #tpu.memory_space<vmem>>, vector<3x8xf32>
    tpu.vector_store %arg9[%c0_22, %c0_23], %31 {strides = array<i32>} : memref<3x8xf32, #tpu.memory_space<vmem>>, vector<3x8xf32>,
    %c0_i32_24 = arith.constant 0 : i32
    %33 = arith.cmpi eq, %arg2, %c0_i32_24 : i32
    %34 = arith.extui %33 : i1 to i32
    %c0_i32_25 = arith.constant 0 : i32
    %35 = arith.cmpi ne, %34, %c0_i32_25 : i32
    scf.if %35 {
      %c0_26 = arith.constant 0 : index
      %c0_27 = arith.constant 0 : index
      %36 = vector.load %arg8[%c0_26, %c0_27] : memref<1x8xf32, #tpu.memory_space<vmem>>, vector<1x8xf32>
      %37 = tpu.reciprocal %36 {approx = true} : vector<1x8xf32> -> vector<1x8xf32>
      %c0_28 = arith.constant 0 : index
      %c0_29 = arith.constant 0 : index
      %38 = vector.load %arg9[%c0_28, %c0_29] : memref<3x8xf32, #tpu.memory_space<vmem>>, vector<3x8xf32>
      %39 = vector.broadcast %37 : vector<1x8xf32> to vector<3x8xf32>
      %40 = arith.mulf %38, %39 : vector<3x8xf32>
      %c0_30 = arith.constant 0 : index
      %c0_31 = arith.constant 0 : index
      %c0_32 = arith.constant 0 : index
      %41 = vector.load %arg6[%c0_30, %c0_31, %c0_32] : memref<1x3x8xf32, #tpu.memory_space<vmem>>, vector<1x3x8xf32>
      %42 = vector.shape_cast %41 : vector<1x3x8xf32> to vector<3x8xf32>
      %43 = vector.shape_cast %40 : vector<3x8xf32> to vector<1x3x8xf32>
      tpu.vector_store %arg6[%c0_30, %c0_31, %c0_32], %43 {strides = array<i32>} : memref<1x3x8xf32, #tpu.memory_space<vmem>>, vector<1x3x8xf32>,
    } else {
    }
    return
  }
  func.func @transform_0(%arg0: i32, %arg1: i32, %arg2: i32) -> (i32, i32, i32) {
    %c0_i32 = arith.constant 0 : i32
    %c0_i32_0 = arith.constant 0 : i32
    return %arg0, %arg1, %c0_i32 : i32, i32, i32
  }
  func.func @transform_1(%arg0: i32, %arg1: i32, %arg2: i32) -> (i32, i32, i32) {
    %c0_i32 = arith.constant 0 : i32
    %c0_i32_0 = arith.constant 0 : i32
    return %arg0, %arg2, %c0_i32 : i32, i32, i32
  }
  func.func @transform_2(%arg0: i32, %arg1: i32, %arg2: i32) -> (i32, i32, i32) {
    %c0_i32 = arith.constant 0 : i32
    %c0_i32_0 = arith.constant 0 : i32
    return %arg0, %c0_i32, %arg2 : i32, i32, i32
  }
  func.func @transform_3(%arg0: i32, %arg1: i32, %arg2: i32) -> (i32, i32, i32) {
    %c0_i32 = arith.constant 0 : i32
    %c0_i32_0 = arith.constant 0 : i32
    return %arg0, %c0_i32, %arg1 : i32, i32, i32
  }
}

</mosaic_0001>

<bundles_post_ra>
// kernel: tpu_custom_call.1
= control target key start
LH: loop header
LB: loop body
LE: loop exit
PB: predicated region body
PF: predicated region fallthrough
CT: control target
= control target key end

     0   :  { %8 = vsyncpa [#allocation6], 0  ;;  %s1111_s0 = inlined_call_operand.hbm [shape: f32[2,8,32], index: 0, kind: input, shape index: {}]   ;;  %s1112_s1 = inlined_call_operand.hbm [shape: f32[2,16,32], index: 1, kind: input, shape index: {}]   ;;  %s1113_s2 = inlined_call_operand.vmem [shape: f32[2,3,16], index: 2, kind: input, shape index: {}]   ;;  %s1114_s3 = inlined_call_operand.vmem [shape: f32[2,3,8], index: 3, kind: output, shape index: {}]  }
   0x1   :  { %10 = vsyncpa [#allocation6 + $0x1], 0 }
   0x2   :  { %11 = vsyncpa [#allocation8], 0 }
   0x3   :  { %13 = vsyncpa [#allocation8 + $0x1], 0  ;;  %s916_s12 = smov 0   ;;  %s918_s13 = smov 0  }
   0x4   :  { %s920_s14 = smov 0   ;;  %s922_s15 = smov 0  }
   0x5   :  { %s924_s16 = smov 0   ;;  %s926_s17 = smov 0  }
   0x6 LB: > { %s656_s18 = sadd.s32 4294967295, %s886_s17   ;;  %s38_s19 = sadd.s32 1, %s882_s16  ;;  %s886_s17 = sphi %s926_s17, %s19_s17   ;;  %s882_s16 = sphi %s924_s16, %s1127_s16   ;;  %s878_s15 = sphi %s922_s15, %s1126_s15   ;;  %s874_s14 = sphi %s920_s14, %s1125_s14   ;;  %s870_s13 = sphi %s918_s13, %s1124_s13   ;;  %s866_s12 = sphi %s916_s12, %s1123_s12  }
   0x7   : > { %p40_p0 = scmp.ge.s32.totalorder %s38_s19, 2  ;;  %s47_s20 = sadd.s32 1, %s874_s14 }
   0x8   : > { %p54_p1 = scmp.ne.s32.totalorder %s874_s14, %s870_s13  ;;  %p55_p2 = scmp.eq.s32.totalorder %s886_s17, 0 }
   0x9   : > { %s1129_s19 = smov (%p40_p0, %s38_s19), 0  ;;  %p60_p4 = scmp.ne.s32.totalorder %s870_s13, %s866_s12 }
   0xa   : > { %p952_p3 = por %p55_p2, %p54_p1  ;;  %s42_s22 = ssub.s32 %s882_s16, %s1129_s19 }
   0xb   : > { %p61_p5 = scmp.eq.s32.totalorder %s656_s18, 0  ;;  %p45_p6 = scmp.eq.s32.totalorder %s42_s22, 0 }
   0xc   : > { %p709_p8 = scmp.lt.s32.totalorder %s886_s17, 2  ;;  %s968_s25 = sand.u32 1, %s874_s14  }
   0xd   : > { %p959_p7 = por %p61_p5, %p60_p4  ;;  %s661_s26 = sshll.u32 %s882_s16, 7 }
   0xe   : > { %s965_s24 = scalar_select %p45_p6, %s874_s14, %s47_s20  }
   0xf   : > { %s1117_s23 = scalar_select %p959_p7, 1, 0 }
  0x10   : > { %s660_s27 = sshll.u32 %s968_s25, 3  ;;  %s975_s30 = scalar_lea.hbm %s1111_s0, %s661_s26 }
  0x11   : > { %s172_s4 = scalar_lea.vmem [#allocation5], %s660_s27  ;;  %p979_p9 = pnand %p709_p8, %p952_p3 }
  0x12   : > { %s180_s5 = sshll.u32 %s172_s4, 4  ;;  %s169_s7 = scalar_lea.sflag [#allocation6], %s968_s25  ;;  %s983_s5 = int_to_ptr.vmem [resolvable:$true] %s180_s5 }
  0x13   : > { %s772_s8 = scalar_lea.hbm %s975_s30, 128  ;;  %p774_p13 = pneg %p979_p9 }
  0x14   : > { %p773_p12 = scmp.ne.s32.totalorder %s975_s30, %s772_s8  ;;  %s777_s11 = scalar_lea.hbm %s1111_s0, 256 }
  0x15   : > { %p778_p2 = scmp.lt.u32.totalorder %s975_s30, %s1111_s0  ;;  %p779_p3 = scmp.lt.u32.totalorder %s777_s11, %s772_s8 }
  0x16   : > { %p775_p0 = pnand %p774_p13, %p773_p12  ;;  %p781_p5 = scmp.lt.u32.totalorder %s772_s8, %s975_s30 }
  0x17   : > { %p780_p4 = por %p779_p3, %p778_p2 }
  0x18   : > { %p776_p1 = pneg %p775_p0 }
  0x19   : > { %p782_p6 = por %p781_p5, %p780_p4 }
  0x1b   : > { %p783_p8 = pnand %p782_p6, %p776_p1 }
  0x1d   : > { %786 = shalt.err (!%p783_p8)
}
  0x1e   : > { %s787_s20 = scalar_lea.vmem %s983_s5, 128  ;;  %s888_s21 = smov [#allocation5]  }
  0x1f   : > { %p788_p12 = scmp.ne.s32.totalorder %s983_s5, %s787_s20  ;;  %s792_s22 = sshll.u32 %s888_s21, 4  ;;  %s793_s22 = int_to_ptr.vmem [resolvable:$false] %s792_s22 }
  0x20   : > { %s794_s26 = scalar_lea.vmem %s793_s22, 256  ;;  %p795_p11 = scmp.lt.s32.totalorder %s983_s5, %s793_s22 }
  0x21   : > { %p790_p0 = pnand %p788_p12, %p774_p13  ;;  %p796_p2 = scmp.lt.s32.totalorder %s794_s26, %s787_s20 }
  0x23   : > { %p791_p10 = pneg %p790_p0  ;;  %p797_p3 = por %p796_p2, %p795_p11 }
  0x25   : > { %p798_p4 = pnand %p797_p3, %p791_p10 }
  0x27   : > { %801 = shalt.err (!%p798_p4)
}
  0x28   : > { %705 = dma.hbm_to_vmem [thread:$0]  (!%p979_p9), %s975_s30, 128, %s983_s5, %s169_s7  }
  0x29   : > { %p1119_p1 = scmp.lt.s32.totalorder %s886_s17, 3  ;;  %p1120_p5 = scmp.ge.s32.totalorder %s886_s17, 1 }
  0x2a   : > { %s662_s28 = sshll.u32 %s968_s25, 4  ;;  %s676_s29 = sshll.u32 %s882_s16, 8 }
  0x2b   : > { %p1017_p6 = pnand %p1120_p5, %p1119_p1  ;;  %s1026_s9 = scalar_lea.hbm %s1112_s1, %s676_s29 }
  0x2c   : > { %s191_s10 = scalar_lea.vmem [#allocation7], %s662_s28  ;;  %s188_s30 = scalar_lea.sflag [#allocation8], %s968_s25 }
  0x2d   : > { %s200_s11 = sshll.u32 %s191_s10, 4  ;;  %s802_s5 = scalar_lea.hbm %s1026_s9, 256  ;;  %s1028_s11 = int_to_ptr.vmem [resolvable:$true] %s200_s11 }
  0x2e   : > { %p803_p10 = scmp.ne.s32.totalorder %s1026_s9, %s802_s5  ;;  %s807_s18 = scalar_lea.hbm %s1112_s1, 512 }
  0x2f   : > { %p808_p12 = scmp.lt.u32.totalorder %s1026_s9, %s1112_s1  ;;  %p809_p0 = scmp.lt.u32.totalorder %s807_s18, %s802_s5 }
  0x30   : > { %p805_p11 = pnand %p803_p10, %p774_p13  ;;  %p811_p3 = scmp.lt.u32.totalorder %s802_s5, %s1026_s9 }
  0x31   : > { %p810_p2 = por %p809_p0, %p808_p12 }
  0x32   : > { %p806_p8 = pneg %p805_p11 }
  0x33   : > { %p812_p4 = por %p811_p3, %p810_p2 }
  0x35   : > { %p813_p1 = pnand %p812_p4, %p806_p8 }
  0x37   : > { %816 = shalt.err (!%p813_p1)
}
  0x38   : > { %s817_s22 = scalar_lea.vmem %s1028_s11, 256  ;;  %s889_s26 = smov [#allocation7]  }
  0x39   : > { %p818_p5 = scmp.ne.s32.totalorder %s1028_s11, %s817_s22  ;;  %s822_s28 = sshll.u32 %s889_s26, 4  ;;  %s823_s28 = int_to_ptr.vmem [resolvable:$false] %s822_s28 }
  0x3a   : > { %s824_s29 = scalar_lea.vmem %s823_s28, 512  ;;  %p825_p7 = scmp.lt.s32.totalorder %s1028_s11, %s823_s28 }
  0x3b   : > { %p820_p10 = pnand %p818_p5, %p774_p13  ;;  %p826_p12 = scmp.lt.s32.totalorder %s824_s29, %s817_s22 }
  0x3d   : > { %p821_p11 = pneg %p820_p10  ;;  %p827_p0 = por %p826_p12, %p825_p7 }
  0x3f   : > { %p828_p2 = pnand %p827_p0, %p821_p11 }
  0x41   : > { %831 = shalt.err (!%p828_p2)
}
  0x42   : > { %s890_s4 = smov 128   ;;  %s891_s8 = smov 8  }
  0x43   : > { %708 = dma.hbm_to_vmem [thread:$0]  (!%p979_p9), %s1026_s9, 256, %s1028_s11, %s188_s30, %s890_s4, %s890_s4, %s891_s8  }
  0x44   : > { %222 = sbr.rel (%p1017_p6) target bundleno = 562 (0x232), region = 32  ;;  %s224_s10 = sand.u32 (!%p1017_p6), 1, %s870_s13  }
  0x45   : > { %s666_s5 = sshll.u32 (!%p1017_p6), %s224_s10, 3  ;;  %s225_s7 = scalar_lea.sflag (!%p1017_p6), [#allocation6], %s224_s10 }
  0x46   : > { %s228_s12 = scalar_lea.vmem (!%p1017_p6), [#allocation5], %s666_s5  ;;  %p1122_p7 = scmp.ne.s32.totalorder (!%p1017_p6), %s1117_s23, 0 }
  0x4b   : > { %857 = dma.done.wait (%p1122_p7), %s225_s7, 128  }
  0x4c   : > { %859 = vsyncadd (%p1122_p7), %s225_s7, 4294967168  ;;  %s667_s18 = sshll.u32 %s224_s10, 4  ;;  %s234_s20 = scalar_lea.sflag [#allocation8], %s224_s10 }
  0x4d   : > { %s237_s6 = scalar_lea.vmem [#allocation7], %s667_s18 }
  0x4e   : > { %861 = dma.done.wait (%p1122_p7), %s234_s20, 256  }
  0x4f   : > { %863 = vsyncadd (%p1122_p7), %s234_s20, 4294967040  ;;  %vm301_vm0 = vcmask 261120   ;;  %v298_v0 = vld [vmem:[%s228_s12] sm:$0xff]  ;;  %v299_v1 = vld [vmem:[%s237_s6] sm:$0xff]  ;;  %vm293_vm1 = vcmask 57344   ;;  %v892_v3 = vmov -inf   ;;  %v402_v13 = vlaneseq }
  0x50   : > { %683 = vmatprep.subr.msk.mxu0 %vm301_vm0, %v298_v0  ;;  %685 = vmatprep.mubr.msk.f32.mxu0 %vm301_vm0, %v299_v1  ;;  %v300_v2 = vld [vmem:[%s237_s6 + $0x8] sm:$0xff]  ;;  %294 = vst.msk [vmem:[#allocation2] sm:$0x1] %vm293_vm1, %v892_v3  ;;  %v893_v4 = vmov 0.0   ;;  %vm296_vm2 = vcmask 59392   ;;  %v894_v5 = vmov 0.0|0.0  }
  0x51   : > { %684 = vmatpush3.xpose.msk.msra.mxu0 %vm301_vm0, %v298_v0  ;;  %295 = vst.msk [vmem:[#allocation3] sm:$0x1] %vm293_vm1, %v893_v4  ;;  %695 = vmatprep.subr.bf16.mxu1 %v894_v5  ;;  %vm895_vm3 = vmmov 0   ;;  %vm387_vm4 = vcmask 64512   ;;  %v403_v16 = vshrl.u32 %v402_v13, 7  ;;  %p275_p9 = scmp.lt.s32.totalorder %s878_s15, 1 }
  0x52   : > { %297 = vst.msk [vmem:[#allocation4] sm:$0x7] %vm296_vm2, %v893_v4  ;;  %692 = vmatprep.mubr.msk.f32.mxu1 %vm895_vm3, %v893_v4  ;;  %vm437_vm5 = vcmask 130048  }
  0x53   : > { %v404_v20 = vsub.s32 0, %v403_v16  ;;  %s1131_s15 = smov (!%p275_p9, %s878_s15), 1 }
  0x54   : > { %686 = vmatmul.mubr.msk.f32.vlgmr.msra.gmra.mrb[0].mxu0 %vm301_vm0, %v300_v2  ;;  %s668_s23 = sshll.u32 %s1131_s15, 2 }
  0x55   : > { %s281_s9 = scalar_lea.vmem %s1113_s2, %s668_s23  ;;  %s288_s21 = scalar_lea.vmem %s1114_s3, %s668_s23 }
  0x56   : > { %v428_v37 = vld [vmem:[%s281_s9] sm:$0x7] }
  0x57   : > { %v386_v18 = vld [vmem:[#allocation2] sm:$0x1] }
  0x58   : > { %v413_v42 = vld [vmem:[#allocation3] sm:$0x1] }
  0x59   : > { %v429_v48 = vld [vmem:[#allocation4] sm:$0x7] }
 0x127   : > { %v687_v6 = vpop.f32.mrb[0].mxu0 }
 0x128   : > { %v389_v7 = vsel %vm387_vm4, %v687_v6, -inf  ;;  %v377_v8 = vpop.f32.mrb[1].mxu0 }
 0x129   : > { %v388_v9 = vsel %vm387_vm4, %v377_v8, -inf }
 0x12a   : > { %v390_v10 = vmax.f32 %v388_v9, %v389_v7 }
 0x12c   : > { %v391_v11 = vrot.slane %v390_v10, 4 }
 0x12e   : > { %v392_v12 = vmax.f32 %v390_v10, %v391_v11 }
 0x130   : > { %v393_v14 = vrot.slane %v392_v12, 2 }
 0x132   : > { %v394_v15 = vmax.f32 %v392_v12, %v393_v14 }
 0x134   : > { %v395_v17 = vrot.slane %v394_v15, 1 }
 0x136   : > { %v396_v19 = vmax.f32 %v394_v15, %v395_v17 }
 0x138   : > { %v397_v21 = vmax.f32 %v386_v18, %v396_v19 }
 0x13a   : > { %v398_v22 = vsub.f32 %v386_v18, %v397_v21  ;;  %v405_v23 = vrot.slane %v397_v21, %v404_v20  ;;  %427 = vst.msk [vmem:[#allocation2] sm:$0x1] %vm293_vm1, %v397_v21 }
 0x13c   : > { %v399_v24 = vmul.f32 1.442695, %v398_v22  ;;  %v407_v25 = vsub.f32 %v377_v8, %v405_v23  ;;  %v408_v26 = vsub.f32 %v687_v6, %v405_v23 }
 0x13e   : > { %764 = vpow2.f32 %v399_v24  ;;  %v409_v27 = vmul.f32 1.442695, %v407_v25  ;;  %v411_v28 = vmul.f32 1.442695, %v408_v26 }
 0x140   : > { %766 = vpow2.f32 %v409_v27 }
 0x141   : > { %768 = vpow2.f32 %v411_v28 }
 0x148   : > { %v765_v29 = vpop.eup %764 }
 0x149   : > { %v434_v30 = vrot.slane %v765_v29, %v404_v20  ;;  %v414_v45 = vmul.f32 %v765_v29, %v413_v42 }
 0x14a   : > { %v767_v31 = vpop.eup %766 }
 0x14b   : > { %v769_v32 = vpop.eup %768  ;;  %v415_v33 = vsel %vm387_vm4, %v767_v31, 0.0  ;;  %v436_v49 = vmul.f32 %v434_v30, %v429_v48 }
 0x14c   : > { %v416_v34 = vsel %vm387_vm4, %v769_v32, 0.0  ;;  %v696_v35 = vpack.c.bf16 %v769_v32, %v767_v31 }
 0x14d   : > { %v417_v36 = vadd.f32 %v416_v34, %v415_v33 }
 0x14e   : > { %697 = vmatpush3.bf16.msra.mxu1 %v696_v35 }
 0x14f   : > { %v418_v38 = vrot.slane %v417_v36, 4 }
 0x151   : > { %v419_v39 = vadd.f32 %v418_v38, %v417_v36  ;;  %693 = vmatmul.mubr.msk.f32.vlgmr.msra.gmra.mrb[0].mxu1 %vm437_vm5, %v428_v37 }
 0x153   : > { %v420_v40 = vrot.slane %v419_v39, 2 }
 0x155   : > { %v421_v41 = vadd.f32 %v420_v40, %v419_v39 }
 0x157   : > { %v422_v43 = vrot.slane %v421_v41, 1 }
 0x159   : > { %v423_v44 = vadd.f32 %v422_v43, %v421_v41 }
 0x15b   : > { %v424_v46 = vadd.f32 %v423_v44, %v414_v45 }
 0x15d   : > { %426 = vst.msk [vmem:[#allocation3] sm:$0x1] %vm293_vm1, %v424_v46 }
 0x164   : > { %v517_v47 = vld [vmem:[#allocation3] sm:$0x1] }
 0x165   : > { %770 = vrcp.f32 %v517_v47 }
 0x16f   : > { %v771_v53 = vpop.eup %770 }
 0x170   : > { %v524_v54 = vrot.slane %v771_v53, %v404_v20 }
 0x224   : > { %v507_v50 = vpop.f32.mrb[0].mxu1 }
 0x225   : > { %v511_v51 = vadd.f32 %v507_v50, %v436_v49  ;;  %v694_v52 = vpop.f32.mrb[1].mxu1 }
 0x227   : > { %513 = vst.msk [vmem:[#allocation4] sm:$0x7] %vm296_vm2, %v511_v51 }
 0x22e   : > { %v519_v55 = vld [vmem:[#allocation4] sm:$0x7] }
 0x22f   : > { %v526_v56 = vmul.f32 %v524_v54, %v519_v55 }
 0x231   : > { %527 = vst.msk [vmem:[%s288_s21] sm:$0x7] %vm296_vm2, %v526_v56 }
 0x232 PF: > { %s19_s17 = sadd.s32 1, %s886_s17   ;;  %s1123_s12 = smov %s870_s13 }
 0x233   : > { %p16_p13 = scmp.ge.s32.totalorder %s19_s17, 4   ;;  %s1124_s13 = smov %s874_s14 }
 0x234   : > { %s1125_s14 = smov %s965_s24  ;;  %s1126_s15 = smov %s882_s16 }
 0x235   : > { %s1127_s16 = smov %s1129_s19  ;;  %18 = sbr.rel (!%p16_p13) target bundleno = 6 (0x6), region = 96 }
 0x23c   :  { %553 = vsyncpa [#allocation6], 1 }
 0x23d   :  { %555 = vsyncpa [#allocation6 + $0x1], 1 }
 0x23e   :  { %556 = vsyncpa [#allocation8], 1 }
 0x23f   :  { %558 = vsyncpa [#allocation8 + $0x1], 1 }

</bundles_post_ra>
